<compile_context>
chip_gen: v7x
topology: tpu7x:2x2x1
jax: 0.10.0
libtpu: 0.0.40
codegen_flags: <defaults>
</compile_context>

<pallas_src>
import functools
import math

import jax
import jax.numpy as jnp
from jax.experimental import pallas as pl
from jax.experimental.pallas import tpu as pltpu


def make_positional_encoding_table(d_model: int, max_len: int = 5000) -> jnp.ndarray:
    """Reference buffer identical to the torch __init__ (shape [max_len, 1, d_model])."""
    position = jnp.arange(max_len, dtype=jnp.float32)[:, None]
    div_term = jnp.exp(
        jnp.arange(0, d_model, 2, dtype=jnp.float32) * (-math.log(10000.0) / d_model)
    )
    pe = jnp.zeros((max_len, 1, d_model), dtype=jnp.float32)
    pe = pe.at[:, 0, 0::2].set(jnp.sin(position * div_term))
    pe = pe.at[:, 0, 1::2].set(jnp.cos(position * div_term))
    return pe


def _pe_dropout_kernel(seed_ref, x_ref, o_ref, *, p: float, training: bool, batch: int):
    rows, d_model = x_ref.shape                       # static block shape (tile_rows, D)
    base = pl.program_id(0) * rows                    # first global flat row of this block

    # ---- sinusoidal table for this tile, generated on the fly (no pe HBM read) ----
    row = base + jax.lax.broadcasted_iota(jnp.int32, (rows, d_model), 0)
    # seq position = row // batch; computed as floor((r+0.5)/B) in f32 to avoid a
    # vector integer divide.  Exact for row counts well below 2**22.
    pos = jnp.floor((row.astype(jnp.float32) + 0.5) * jnp.float32(1.0 / batch))
    d = jax.lax.broadcasted_iota(jnp.int32, (rows, d_model), 1)
    odd = (d & 1).astype(jnp.float32)                 # 1.0 on odd feature indices
    pair = (d - (d & 1)).astype(jnp.float32)          # 2 * (d // 2), as in torch
    inv_freq = jnp.exp(pair * jnp.float32(-math.log(10000.0) / d_model))
    # even d: sin(pos*w);  odd d: cos(pos*w) == sin(pos*w + pi/2)  (one EUP op)
    pe = jnp.sin(pos * inv_freq + odd * jnp.float32(math.pi / 2.0))

    y = x_ref[...].astype(jnp.float32) + pe

    if training and p > 0.0:
        # Inverted dropout from the on-chip PRNG, integer threshold compare.
        # TODO(synk): RNG stream differs from torch.nn.Dropout (and depends on the
        #             tiling); semantics match: keep-prob 1-p, scale 1/(1-p).
        pltpu.prng_seed(seed_ref[0] + pl.program_id(0))
        bits = pltpu.prng_random_bits((rows, d_model))
        r31 = bits & jnp.asarray(0x7FFFFFFF, bits.dtype)        # uniform in [0, 2**31)
        thresh = min(int(round(p * (1 << 31))), (1 << 31) - 1)
        keep = r31 >= jnp.asarray(thresh, bits.dtype)
        y = jnp.where(keep, y * jnp.float32(1.0 / (1.0 - p)), 0.0)

    o_ref[...] = y.astype(o_ref.dtype)


def _choose_tile_rows(n_rows: int, row_bytes: int,
                      target_bytes: int = 1 << 20, min_steps: int = 8) -> int:
    """~1 MiB blocks, >= min_steps pipeline stages, sublane-multiple row count."""
    tile = max(1, target_bytes // max(row_bytes, 1))
    tile = min(tile, pl.cdiv(n_rows, min_steps))
    tile = max(8, (tile // 8) * 8)
    return n_rows if tile >= n_rows else tile


def positional_encoding_forward(x: jnp.ndarray, *, p: float = 0.1, training: bool = False,
                                seed: int = 0, tile_rows: int | None = None,
                                max_len: int = 5000) -> jnp.ndarray:
    """x: [seq_len, batch, d_model]; returns dropout(x + pe[:seq_len])."""
    S, B, D = x.shape
    assert S <= max_len, "seq_len exceeds max_len (mirrors the torch pe buffer slice)"

    R = S * B
    x2 = x.reshape(R, D)      # free row-major reshape: rows sublane-dense, d_model on lanes

    if tile_rows is None:
        tile_rows = _choose_tile_rows(R, D * x.dtype.itemsize)
    if tile_rows != R and tile_rows % 8 != 0:
        raise ValueError("tile_rows must be a multiple of 8 (or equal seq_len*batch)")

    grid = (pl.cdiv(R, tile_rows),)
    kernel = functools.partial(_pe_dropout_kernel, p=float(p),
                               training=bool(training), batch=B)
    seed_arr = jnp.asarray([seed], dtype=jnp.int32)

    out2 = pl.pallas_call(
        kernel,
        out_shape=jax.ShapeDtypeStruct((R, D), x.dtype),
        grid_spec=pltpu.PrefetchScalarGridSpec(
            num_scalar_prefetch=1,                               # dropout seed -> SMEM
            grid=grid,
            in_specs=[pl.BlockSpec((tile_rows, D), lambda i, seed: (i, 0))],
            out_specs=pl.BlockSpec((tile_rows, D), lambda i, seed: (i, 0)),
        ),
        compiler_params=pltpu.CompilerParams(
            dimension_semantics=("parallel",),   # row tiles independent (v7x 2-TC sharding)
            vmem_limit_bytes=32 * 1024 * 1024,   # ample headroom; blocks are ~1 MiB, 2x-buffered
        ),
    )(seed_arr, x2)
    return out2.reshape(S, B, D)


if __name__ == "__main__":
    d_model, seq_len, batch, max_len = 32, 8, 2, 64

    key = jax.random.PRNGKey(0)
    x = jax.random.normal(key, (seq_len, batch, d_model), dtype=jnp.float32)

    # Eval-mode forward (dropout identity), matching module.eval() semantics.
    out = jax.block_until_ready(
        positional_encoding_forward(x, p=0.1, training=False, max_len=max_len))

    # Reference: plain-JAX replica of the torch buffer + broadcast add.
    pe = make_positional_encoding_table(d_model, max_len)
    ref = x + pe[:seq_len]

    assert out.shape == (seq_len, batch, d_model)
    assert jnp.allclose(out, ref, atol=1e-4, rtol=1e-4), \
        float(jnp.max(jnp.abs(out - ref)))

    print("KERNEL_OK")
</pallas_src>

<mosaic_0001>
module attributes {stable_mosaic.version = 11 : i64} {
  func.func @_pe_dropout_kernel(%arg0: i32, %arg1: memref<1xi32, #tpu.memory_space<smem>>, %arg2: memref<8x32xf32, #tpu.memory_space<vmem>>, %arg3: memref<8x32xf32, #tpu.memory_space<vmem>>) attributes {dimension_semantics = [#tpu.dimension_semantics<parallel>], iteration_bounds = array<i64: 2>, scalar_prefetch = 1 : i64, scratch_operands = 0 : i64, tpu.core_type = #tpu.core_type<tc>, window_params = [{transform_indices = @transform_0, window_bounds = array<i64: 8, 32>}, {transform_indices = @transform_1, window_bounds = array<i64: 8, 32>}]} {
    %c8_i32 = arith.constant 8 : i32
    %0 = arith.muli %arg0, %c8_i32 : i32
    %1 = tpu.iota {dimensions = array<i32: 0>} : vector<8x32xi32>
    %2 = vector.broadcast %0 : i32 to vector<8x32xi32>
    %3 = arith.addi %2, %1 : vector<8x32xi32>
    %4 = arith.sitofp %3 : vector<8x32xi32> to vector<8x32xf32>
    %cst = arith.constant 5.000000e-01 : f32
    %5 = vector.broadcast %cst : f32 to vector<8x32xf32>
    %6 = arith.addf %4, %5 : vector<8x32xf32>
    %cst_0 = arith.constant 5.000000e-01 : f32
    %7 = vector.broadcast %cst_0 : f32 to vector<8x32xf32>
    %8 = arith.mulf %6, %7 : vector<8x32xf32>
    %9 = math.floor %8 : vector<8x32xf32>
    %10 = tpu.iota {dimensions = array<i32: 1>} : vector<8x32xi32>
    %c1_i32 = arith.constant 1 : i32
    %11 = vector.broadcast %c1_i32 : i32 to vector<8x32xi32>
    %12 = arith.andi %10, %11 : vector<8x32xi32>
    %13 = arith.sitofp %12 : vector<8x32xi32> to vector<8x32xf32>
    %c1_i32_1 = arith.constant 1 : i32
    %14 = vector.broadcast %c1_i32_1 : i32 to vector<8x32xi32>
    %15 = arith.andi %10, %14 : vector<8x32xi32>
    %16 = arith.subi %10, %15 : vector<8x32xi32>
    %17 = arith.sitofp %16 : vector<8x32xi32> to vector<8x32xf32>
    %cst_2 = arith.constant -0.287823141 : f32
    %18 = vector.broadcast %cst_2 : f32 to vector<8x32xf32>
    %19 = arith.mulf %17, %18 : vector<8x32xf32>
    %20 = math.exp %19 : vector<8x32xf32>
    %21 = arith.mulf %9, %20 : vector<8x32xf32>
    %cst_3 = arith.constant 1.57079637 : f32
    %22 = vector.broadcast %cst_3 : f32 to vector<8x32xf32>
    %23 = arith.mulf %13, %22 : vector<8x32xf32>
    %24 = arith.addf %21, %23 : vector<8x32xf32>
    %25 = math.sin %24 : vector<8x32xf32>
    %c0 = arith.constant 0 : index
    %c0_4 = arith.constant 0 : index
    %26 = vector.load %arg2[%c0, %c0_4] : memref<8x32xf32, #tpu.memory_space<vmem>>, vector<8x32xf32>
    %27 = arith.addf %26, %25 : vector<8x32xf32>
    %c0_5 = arith.constant 0 : index
    %c0_6 = arith.constant 0 : index
    %28 = vector.load %arg3[%c0_5, %c0_6] : memref<8x32xf32, #tpu.memory_space<vmem>>, vector<8x32xf32>
    tpu.vector_store %arg3[%c0_5, %c0_6], %27 {strides = array<i32>} : memref<8x32xf32, #tpu.memory_space<vmem>>, vector<8x32xf32>,
    return
  }
  func.func @transform_0(%arg0: i32, %arg1: memref<1xi32, #tpu.memory_space<smem>>) -> (i32, i32) {
    %c0_i32 = arith.constant 0 : i32
    %c0_i32_0 = arith.constant 0 : i32
    return %arg0, %c0_i32 : i32, i32
  }
  func.func @transform_1(%arg0: i32, %arg1: memref<1xi32, #tpu.memory_space<smem>>) -> (i32, i32) {
    %c0_i32 = arith.constant 0 : i32
    %c0_i32_0 = arith.constant 0 : i32
    return %arg0, %c0_i32 : i32, i32
  }
}

</mosaic_0001>

<bundles_post_ra>
// kernel: tpu_custom_call.1
= control target key start
LH: loop header
LB: loop body
LE: loop exit
PB: predicated region body
PF: predicated region fallthrough
CT: control target
= control target key end

     0   :  { %8 = vsyncpa [#allocation5], 0  ;;  %s737_s0 = inlined_call_operand.<no memory space> [shape: s32[1], index: 0, kind: input, shape index: {}]   ;;  %s738_s1 = inlined_call_operand.hbm [shape: f32[16,32], index: 1, kind: input, shape index: {}]   ;;  %s739_s2 = inlined_call_operand.hbm [shape: f32[16,32], index: 2, kind: output, shape index: {}]  }
   0x1   :  { %10 = vsyncpa [#allocation5 + $0x1], 0 }
   0x2   :  { %11 = vsyncpa [#allocation6], 0 }
   0x3   :  { %13 = vsyncpa [#allocation6 + $0x1], 0  ;;  %s547_s9 = smov 0   ;;  %s549_s10 = smov 0  }
   0x4   :  { %s551_s11 = smov 0   ;;  %s553_s12 = smov 0  }
   0x5 LB: > { %s568_s0 = sadd.s32 4294967295, %s522_s12   ;;  %s347_s13 = sadd.s32 4294967294, %s522_s12   ;;  %s522_s12 = sphi %s553_s12, %s754_s12   ;;  %s518_s11 = sphi %s551_s11, %s753_s11   ;;  %s514_s10 = sphi %s549_s10, %s752_s10   ;;  %s510_s9 = sphi %s547_s9, %s751_s9  }
   0x6   : > { %s572_s14 = sadd.s32 1, %s522_s12   ;;  %s26_s15 = sadd.s32 1, %s518_s11 }
   0x7   : > { %s23_s16 = ssub.s32 %s522_s12, %s572_s14  ;;  %p33_p0 = scmp.ne.s32.totalorder %s518_s11, %s514_s10 }
   0x8   : > { %p24_p1 = scmp.eq.s32.totalorder %s23_s16, 0  ;;  %p34_p2 = scmp.eq.s32.totalorder %s522_s12, 0 }
   0x9   : > { %p39_p3 = scmp.ne.s32.totalorder %s514_s10, %s510_s9  ;;  %p40_p4 = scmp.eq.s32.totalorder %s568_s0, 0 }
   0xa   : > { %s584_s17 = scalar_select %p24_p1, %s518_s11, %s26_s15  }
   0xb   : > { %p586_p5 = por %p34_p2, %p33_p0  ;;  %p590_p6 = por %p40_p4, %p39_p3 }
   0xc   : > { %p63_p7 = scmp.eq.s32.totalorder %s568_s0, 1  ;;  %p69_p8 = scmp.eq.s32.totalorder %s347_s13, 1 }
   0xd   : > { %p380_p10 = scmp.lt.s32.totalorder %s522_s12, 2  ;;  %s89_s22 = sand.u32 1, %s518_s11  }
   0xe   : > { %p597_p11 = por %p63_p7, %p33_p0  ;;  %p601_p12 = por %p69_p8, %p39_p3 }
   0xf   : > { %s351_s23 = sshll.u32 %s522_s12, 7  ;;  %s350_s24 = sshll.u32 %s89_s22, 3 }
  0x10   : > { %s743_s20 = scalar_select %p597_p11, 1, 0 }
  0x11   : > { %s744_s21 = scalar_select %p601_p12, 1, 0 }
  0x12   : > { %s610_s27 = scalar_lea.hbm %s738_s1, %s351_s23  ;;  %s93_s28 = scalar_lea.vmem [#allocation4], %s350_s24 }
  0x13   : > { %s100_s29 = sshll.u32 %s93_s28, 4  ;;  %p614_p13 = pnand %p380_p10, %p586_p5  ;;  %s618_s29 = int_to_ptr.vmem [resolvable:$true] %s100_s29 }
  0x14   : > { %s90_s3 = scalar_lea.sflag [#allocation5], %s89_s22  ;;  %s426_s4 = scalar_lea.hbm %s610_s27, 128 }
  0x15   : > { %p427_p2 = scmp.ne.s32.totalorder %s610_s27, %s426_s4  ;;  %p428_p3 = pneg %p614_p13 }
  0x16   : > { %s431_s7 = scalar_lea.hbm %s738_s1, 256  ;;  %p432_p5 = scmp.lt.u32.totalorder %s610_s27, %s738_s1 }
  0x17   : > { %p429_p4 = pnand %p428_p3, %p427_p2  ;;  %p433_p8 = scmp.lt.u32.totalorder %s431_s7, %s426_s4 }
  0x18   : > { %p435_p9 = scmp.lt.u32.totalorder %s426_s4, %s610_s27 }
  0x19   : > { %p430_p7 = pneg %p429_p4  ;;  %p434_p10 = por %p433_p8, %p432_p5 }
  0x1b   : > { %p436_p0 = por %p435_p9, %p434_p10 }
  0x1d   : > { %p437_p1 = pnand %p436_p0, %p430_p7 }
  0x1f   : > { %440 = shalt.err (!%p437_p1)
}
  0x20   : > { %s441_s15 = scalar_lea.vmem %s618_s29, 128  ;;  %s524_s16 = smov [#allocation4]  }
  0x21   : > { %p442_p2 = scmp.ne.s32.totalorder %s618_s29, %s441_s15  ;;  %s446_s18 = sshll.u32 %s524_s16, 4  ;;  %s447_s18 = int_to_ptr.vmem [resolvable:$false] %s446_s18 }
  0x22   : > { %s448_s22 = scalar_lea.vmem %s447_s18, 256  ;;  %p449_p11 = scmp.lt.s32.totalorder %s618_s29, %s447_s18 }
  0x23   : > { %p444_p4 = pnand %p442_p2, %p428_p3  ;;  %p450_p5 = scmp.lt.s32.totalorder %s448_s22, %s441_s15 }
  0x25   : > { %p445_p12 = pneg %p444_p4  ;;  %p451_p8 = por %p450_p5, %p449_p11 }
  0x27   : > { %p452_p9 = pnand %p451_p8, %p445_p12 }
  0x29   : > { %455 = shalt.err (!%p452_p9)
}
  0x2a   : > { %375 = dma.hbm_to_vmem [thread:$0]  (!%p614_p13), %s610_s27, 128, %s618_s29, %s90_s3  }
  0x2b   : > { %p746_p0 = scmp.lt.s32.totalorder %s522_s12, 3  ;;  %p747_p1 = scmp.ge.s32.totalorder %s522_s12, 1 }
  0x2d   : > { %p106_p3 = pnand %p747_p1, %p746_p0 }
  0x2e   : > { %s652_s23 = sand.u32 (!%p106_p3), 1, %s514_s10  }
  0x2f   : > { %109 = sbr.rel (%p106_p3) target bundleno = 180 (0xb4), region = 24  ;;  %s353_s24 = sshll.u32 (!%p106_p3), %s652_s23, 3 }
  0x30   : > { %s112_s25 = scalar_lea.sflag (!%p106_p3), [#allocation5], %s652_s23  ;;  %s658_s26 = scalar_lea.vmem (!%p106_p3), [#allocation4], %s353_s24 }
  0x36   : > { %501 = dma.done.wait (%p590_p6), %s112_s25, 128  }
  0x37   : > { %503 = vsyncadd (%p590_p6), %s112_s25, 4294967168  ;;  %s355_s27 = sshll.u32 %s568_s0, 3  ;;  %v135_v0 = vlaneseq  ;;  %v525_v30 = vmov 683565275   ;;  %v526_v32 = vmov 2475754826  }
  0x38   : > { %v137_v2 = vstv %s355_s27  ;;  %v527_v34 = vmov 2131351028   ;;  %v528_v36 = vmov 2102212464   ;;  %v529_v38 = vmov 920167782  }
  0x39   : > { %v136_v1 = vshrl.u32 %v135_v0, 7  ;;  %v144_v3 = vand.u32 127, %v135_v0  ;;  %v530_v45 = vmov 1326507024   ;;  %s133_s19 = scalar_lea.vmem [#allocation7], %s353_s24  ;;  %s361_s29 = sshll.u32 %s568_s0, 7 }
  0x3a   : > { %s277_s28 = sshll.u32 %s133_s19, 4  ;;  %vm261_vm13 = vcmask 261120   ;;  %s695_s4 = scalar_lea.hbm %s739_s2, %s361_s29  ;;  %s690_s28 = int_to_ptr.vmem [resolvable:$true] %s277_s28 }
  0x3b   : > { %v145_v4 = vand.u32 1, %v144_v3  ;;  %v138_v5 = vadd.s32 %v137_v2, %v136_v1  ;;  %s264_s5 = scalar_lea.sflag [#allocation6], %s652_s23  ;;  %s456_s6 = scalar_lea.vmem %s690_s28, 128 }
  0x3c   : > { %p457_p6 = scmp.ne.s32.totalorder %s690_s28, %s456_s6  ;;  %p748_p11 = scmp.ne.s32.totalorder %s743_s20, 0 }
  0x3d   : > { %v147_v6 = vsub.s32 %v144_v3, %v145_v4  ;;  %v139_v8 = vcvt.s32.f32 %v138_v5  ;;  %v146_v13 = vcvt.s32.f32 %v145_v4  ;;  %s531_s0 = smov [#allocation7]  }
  0x3e   : > { %p458_p12 = pnand %p457_p6, %p748_p11  ;;  %s460_s7 = sshll.u32 %s531_s0, 4  ;;  %s461_s7 = int_to_ptr.vmem [resolvable:$false] %s460_s7 }
  0x3f   : > { %v148_v7 = vcvt.s32.f32 %v147_v6  ;;  %v140_v11 = vadd.f32 0.5, %v139_v8  ;;  %v153_v15 = vmul.f32 1.5707964, %v146_v13  ;;  %s462_s8 = scalar_lea.vmem %s461_s7, 256  ;;  %p463_p7 = scmp.lt.s32.totalorder %s690_s28, %s461_s7 }
  0x40   : > { %p459_p13 = pneg %p458_p12  ;;  %p464_p10 = scmp.lt.s32.totalorder %s462_s8, %s456_s6 }
  0x41   : > { %v149_v9 = vmul.f32 -0.28782314, %v148_v7  ;;  %v141_v12 = vmul.f32 0.5, %v140_v11 }
  0x42   : > { %p465_p2 = por %p464_p10, %p463_p7 }
  0x43   : > { %v150_v10 = vmul.f32 1.442695, %v149_v9  ;;  %v142_v14 = vfloor.f32 %v141_v12 }
  0x44   : > { %p466_p4 = pnand %p465_p2, %p459_p13 }
  0x45   : > { %420 = vpow2.f32 %v150_v10 }
  0x4f   : > { %v421_v16 = vpop.eup %420 }
  0x50   : > { %v152_v17 = vmul.f32 %v421_v16, %v142_v14 }
  0x52   : > { %v665_v18 = vadd.f32 %v153_v15, %v152_v17 }
  0x54   : > { %v158_v19 = vand.u32 2139095040, %v665_v18  ;;  %v155_v21 = vand.u32 2147483647, %v665_v18  ;;  %vm157_vm7 = vcmp.lt.s32.totalorder %v665_v18, 0  ;;  %vm247_vm12 = vweird.f32 %v665_v18 }
  0x56   : > { %v159_v20 = vshrl.u32 %v158_v19, 23  ;;  %v162_v24 = vand.u32 8388607, %v155_v21  ;;  %vm156_vm8 = vcmp.le.f32.partialorder %v155_v21, 0.7853982 }
  0x58   : > { %v356_v22 = vadd.s32 4294967169, %v159_v20  ;;  %v163_v27 = vor.u32 8388608, %v162_v24 }
  0x5a   : > { %v165_v23 = vadd.s32 1, %v356_v22  ;;  %v203_v47 = vshll.u32 %v163_v27, 8 }
  0x5c   : > { %vm166_vm0 = vcmp.gt.s32.totalorder %v165_v23, 0 }
  0x5d   : > { %v167_v25 = vsel %vm166_vm0, %v165_v23, 0 }
  0x5e   : > { %v169_v26 = vand.u32 31, %v167_v25  ;;  %v168_v28 = vshrl.u32 %v167_v25, 5 }
  0x60   : > { %v170_v29 = vsub.s32 32, %v169_v26  ;;  %v172_v31 = vshll.u32 %v525_v30, %v169_v26  ;;  %v175_v33 = vshll.u32 %v526_v32, %v169_v26  ;;  %v178_v35 = vshll.u32 %v527_v34, %v169_v26 }
  0x61   : > { %v181_v37 = vshll.u32 %v528_v36, %v169_v26  ;;  %v184_v39 = vshll.u32 %v529_v38, %v169_v26  ;;  %vm187_vm1 = vcmp.lt.s32.totalorder %v168_v28, 1  ;;  %vm190_vm2 = vcmp.lt.s32.totalorder %v168_v28, 4 }
  0x62   : > { %v171_v40 = vshrl.u32 %v525_v30, %v170_v29  ;;  %v173_v41 = vshrl.u32 %v526_v32, %v170_v29  ;;  %v176_v42 = vshrl.u32 %v527_v34, %v170_v29  ;;  %v179_v43 = vshrl.u32 %v528_v36, %v170_v29 }
  0x63   : > { %v182_v44 = vshrl.u32 %v529_v38, %v170_v29  ;;  %v185_v46 = vshrl.u32 %v530_v45, %v170_v29  ;;  %vm188_vm3 = vcmp.lt.s32.totalorder %v168_v28, 2  ;;  %vm189_vm4 = vcmp.lt.s32.totalorder %v168_v28, 3  ;;  %v259_v45 = vld [vmem:[%s658_s26] sm:$0xff] }
  0x64   : > { %v174_v48 = vor.u32 %v173_v41, %v172_v31  ;;  %v177_v49 = vor.u32 %v176_v42, %v175_v33  ;;  %v180_v50 = vor.u32 %v179_v43, %v178_v35 }
  0x65   : > { %v183_v51 = vor.u32 %v182_v44, %v181_v37  ;;  %v186_v52 = vor.u32 %v185_v46, %v184_v39 }
  0x66   : > { %v191_v53 = vsel %vm187_vm1, %v171_v40, %v174_v48  ;;  %v192_v54 = vsel %vm190_vm2, %v180_v50, 2102212464  ;;  %v195_v55 = vsel %vm187_vm1, %v174_v48, %v177_v49  ;;  %v199_v56 = vsel %vm187_vm1, %v177_v49, %v180_v50 }
  0x67   : > { %v193_v57 = vsel %vm189_vm4, %v177_v49, %v192_v54  ;;  %v196_v58 = vsel %vm190_vm2, %v183_v51, 920167782  ;;  %v200_v59 = vsel %vm190_vm2, %v186_v52, 1326507024 }
  0x68   : > { %v197_v60 = vsel %vm189_vm4, %v180_v50, %v196_v58  ;;  %v201_v61 = vsel %vm189_vm4, %v183_v51, %v200_v59  ;;  %v194_v62 = vsel %vm188_vm3, %v191_v53, %v193_v57 }
  0x69   : > { %v198_v63 = vsel %vm188_vm3, %v195_v55, %v197_v60  ;;  %v202_v0 = vsel %vm188_vm3, %v199_v56, %v201_v61  ;;  %v210_v5 = vmul.u32 %v203_v47, %v194_v62 }
  0x6a   : > { %v671_v1 = vmul.u32.u64.low %v203_v47, %v202_v0  ;;  %v672_v2 = vmul.u32.u64.high %v203_v47, %v202_v0, %v671_v1  ;;  %v674_v3 = vmul.u32.u64.low %v203_v47, %v198_v63  ;;  %v675_v4 = vmul.u32.u64.high %v203_v47, %v198_v63, %v674_v3 }
  0x6c   : > { %vm212_vm5 = vc.u32 %v672_v2, %v674_v3  ;;  %v213_v6 = vadd.s32 1, %v675_v4  ;;  %v211_v17 = vadd.s32 %v674_v3, %v672_v2 }
  0x6e   : > { %v214_v7 = vsel %vm212_vm5, %v213_v6, %v675_v4 }
  0x6f   : > { %v215_v8 = vadd.s32 %v214_v7, %v210_v5 }
  0x71   : > { %v216_v9 = vadd.s32 536870912, %v215_v8 }
  0x73   : > { %v217_v10 = vshrl.u32 %v216_v9, 30 }
  0x75   : > { %v218_v11 = vshll.u32 %v217_v10, 30  ;;  %v241_v31 = vsub.s32 4, %v217_v10 }
  0x77   : > { %v219_v12 = vsub.s32 %v215_v8, %v218_v11  ;;  %v242_v34 = vsel %vm157_vm7, %v241_v31, %v217_v10 }
  0x78   : > { %v244_v37 = vsel %vm156_vm8, 0, %v242_v34 }
  0x79   : > { %v221_v13 = vsub.s32 0, %v219_v12  ;;  %v248_v38 = vadd.s32 3, %v244_v37 }
  0x7b   : > { %v357_v14 = vmin.u32 %v221_v13, %v219_v12  ;;  %v249_v39 = vand.u32 3, %v248_v38 }
  0x7d   : > { %v223_v15 = vclz %v357_v14  ;;  %vm254_vm9 = vcmp.eq.s32.totalorder %v249_v39, 2  ;;  %vm251_vm10 = vcmp.eq.s32.totalorder %v249_v39, 0  ;;  %vm250_vm11 = vcmp.lt.s32.totalorder %v249_v39, 2 }
  0x7f   : > { %v358_v16 = vadd.s32 4294967294, %v223_v15 }
  0x81   : > { %vm359_vm6 = vcmp.lt.s32.totalorder %v358_v16, 0 }
  0x82   : > { %v226_v19 = vsel %vm359_vm6, 0, %v358_v16 }
  0x83   : > { %v227_v20 = vsub.s32 32, %v226_v19  ;;  %v228_v22 = vshll.u32 %v219_v12, %v226_v19  ;;  %v231_v23 = vsub.s32 4294967266, %v226_v19 }
  0x85   : > { %v229_v24 = vshrl.u32 %v211_v17, %v227_v20  ;;  %v232_v25 = vadd.s32 127, %v231_v23 }
  0x87   : > { %v230_v26 = vor.u32 %v229_v24, %v228_v22  ;;  %v233_v27 = vshll.u32 %v232_v25, 23 }
  0x89   : > { %v234_v28 = vor.u32 4788187, %v233_v27  ;;  %v237_v29 = vcvt.s32.f32 %v230_v26 }
  0x8b   : > { %v235_v30 = vand.u32 2147483647, %v234_v28 }
  0x8d   : > { %v238_v32 = vmul.f32 %v237_v29, %v235_v30 }
  0x8f   : > { %v239_v33 = vxor.u32 2147483648, %v238_v32 }
  0x91   : > { %v240_v35 = vsel %vm157_vm7, %v239_v33, %v238_v32 }
  0x92   : > { %v243_v36 = vsel %vm156_vm8, %v665_v18, %v240_v35 }
  0x93   : > { %422 = vcosq.f32 %v243_v36 }
  0x94   : > { %424 = vsinq.f32 %v243_v36 }
  0x9d   : > { %v423_v40 = vpop.eup %422 }
  0x9e   : > { %v425_v41 = vpop.eup %424  ;;  %v255_v42 = vxor.u32 2147483648, %v423_v40 }
  0x9f   : > { %v252_v21 = vxor.u32 2147483648, %v425_v41 }
  0xa0   : > { %v256_v43 = vsel %vm254_vm9, %v255_v42, %v425_v41 }
  0xa1   : > { %v253_v44 = vsel %vm251_vm10, %v423_v40, %v252_v21 }
  0xa2   : > { %v257_v46 = vsel %vm250_vm11, %v253_v44, %v256_v43 }
  0xa3   : > { %v258_v47 = vsel %vm247_vm12, nan, %v257_v46 }
  0xa4   : > { %v260_v48 = vadd.f32 %v259_v45, %v258_v47 }
  0xa6   : > { %262 = vst.msk [vmem:[%s133_s19] sm:$0xff] %vm261_vm13, %v260_v48 }
  0xa7   : > { %469 = shalt.err (!%p466_p4)
}
  0xa8   : > { %s470_s13 = scalar_lea.hbm %s695_s4, 128  ;;  %s474_s18 = scalar_lea.hbm %s739_s2, 256 }
  0xa9   : > { %p471_p5 = scmp.ne.s32.totalorder %s695_s4, %s470_s13  ;;  %p475_p0 = scmp.lt.u32.totalorder %s695_s4, %s739_s2 }
  0xaa   : > { %p476_p1 = scmp.lt.u32.totalorder %s474_s18, %s470_s13  ;;  %p478_p6 = scmp.lt.u32.totalorder %s470_s13, %s695_s4 }
  0xab   : > { %p472_p8 = pnand %p471_p5, %p748_p11 }
  0xac   : > { %p477_p3 = por %p476_p1, %p475_p0 }
  0xad   : > { %p473_p9 = pneg %p472_p8 }
  0xae   : > { %p479_p12 = por %p478_p6, %p477_p3 }
  0xb0   : > { %p480_p13 = pnand %p479_p12, %p473_p9 }
  0xb2   : > { %483 = shalt.err (!%p480_p13)
}
  0xb3   : > { %370 = dma.vmem_to_hbm [thread:$0]  (%p748_p11), %s690_s28, 128, %s695_s4, %s264_s5  }
  0xb4 PF: > { %s289_s24 = sand.u32 1, %s510_s9   ;;  %p749_p7 = scmp.ne.s32.totalorder %s744_s21, 0 }
  0xb5   : > { %p750_p10 = scmp.ge.s32.totalorder %s522_s12, 2  ;;  %s290_s25 = scalar_lea.sflag [#allocation6], %s289_s24 }
  0xb7   : > { %p377_p2 = pnand %p750_p10, %p749_p7 }
  0xb9   : > { %505 = dma.done.wait (!%p377_p2), %s290_s25, 128  }
  0xba   : > { %507 = vsyncadd (!%p377_p2), %s290_s25, 4294967168  ;;  %p16_p4 = scmp.ge.s32.totalorder %s572_s14, 4   ;;  %s751_s9 = smov %s514_s10 }
  0xbb   : > { %s752_s10 = smov %s518_s11  ;;  %s753_s11 = smov %s584_s17 }
  0xbc   : > { %s754_s12 = smov %s572_s14  ;;  %18 = sbr.rel (!%p16_p4) target bundleno = 5 (0x5), region = 69 }
  0xc3   :  { %295 = vsyncpa [#allocation5], 1 }
  0xc4   :  { %297 = vsyncpa [#allocation5 + $0x1], 1 }
  0xc5   :  { %298 = vsyncpa [#allocation6], 1 }
  0xc6   :  { %300 = vsyncpa [#allocation6 + $0x1], 1 }

</bundles_post_ra>
